<compile_context>
chip_gen: v7x
topology: tpu7x:2x2x1
jax: 0.10.0
libtpu: 0.0.40
codegen_flags: <defaults>
</compile_context>

<pallas_src>
import functools

import jax
import jax.numpy as jnp
from jax.experimental import pallas as pl
from jax.experimental.pallas import tpu as pltpu


def _round_up(x: int, m: int) -> int:
    return ((x + m - 1) // m) * m


def _normalize_kernel(x_ref, xn_ref):
    """L2-normalize a (blk, D) row-block (torch.nn.functional.normalize, eps=1e-12)."""
    x = x_ref[...].astype(jnp.float32)
    norm_sq = jnp.sum(x * x, axis=-1, keepdims=True)
    inv_norm = jax.lax.rsqrt(jnp.maximum(norm_sq, 1e-24))
    xn_ref[...] = x * inv_norm


def _pair_block_kernel(bi_ref, bj_ref, xi_ref, xj_ref, lc_ref, lr_ref, out_ref,
                       *, pos_margin: float, neg_margin: float,
                       n_valid: int, n_pad: int):
    t = pl.program_id(0)
    tm = xi_ref.shape[0]
    tn = xj_ref.shape[0]
    i = bi_ref[t]                       # row-block index (scalar, SMEM)
    j = bj_ref[t]                       # col-block index (scalar, SMEM)
    row0 = i * tm
    col0 = j * tn

    xi = xi_ref[...]                    # (tm, D) f32, pre-normalized (VMEM-resident over j)
    xj = xj_ref[...]                    # (tn, D) f32, pre-normalized
    # Contract both operands on D -> no transpose materialized.
    gram = jax.lax.dot_general(
        xi, xj,
        dimension_numbers=(((1,), (1,)), ((), ())),
        preferred_element_type=jnp.float32)                 # (tm, tn)
    dist = jnp.sqrt(jnp.maximum(2.0 - 2.0 * gram, 0.0))

    same = lc_ref[...] == lr_ref[...]   # (tm,1)==(1,tn) -> (tm,tn) bool

    # Fold the PML default pos_margin == 0 at trace time (dist >= 0 by construction).
    if pos_margin == 0.0:
        pos_vals = dist
    else:
        pos_vals = jnp.maximum(dist - pos_margin, 0.0)
    neg_vals = jnp.maximum(neg_margin - dist, 0.0)

    # Blocks that straddle the diagonal need the strict-upper (c > r) mask; blocks that
    # touch the padded tail need the validity mask.  All other (interior, fully-above)
    # blocks skip mask construction entirely.
    needs_mask = col0 < row0 + tm
    if n_pad != n_valid:
        needs_mask = jnp.logical_or(
            needs_mask,
            jnp.logical_or(row0 + tm > n_valid, col0 + tn > n_valid))

    def _emit(pos_sel, neg_sel):
        # Only strict-upper pairs are counted; sums AND counts are both halved vs the
        # ordered-pair reference, so the AvgNonZero ratios are unchanged.
        ps = jnp.sum(pos_sel)
        pc = jnp.sum(jnp.where(pos_sel > 0.0, 1.0, 0.0))
        ns = jnp.sum(neg_sel)
        nc = jnp.sum(jnp.where(neg_sel > 0.0, 1.0, 0.0))
        lane = jax.lax.broadcasted_iota(jnp.int32, (1, 1, 128), 2)
        out_ref[...] = (jnp.where(lane == 0, ps, 0.0)
                        + jnp.where(lane == 1, pc, 0.0)
                        + jnp.where(lane == 2, ns, 0.0)
                        + jnp.where(lane == 3, nc, 0.0))

    @pl.when(jnp.logical_not(needs_mask))
    def _fast():
        # Fully above the diagonal, no padding: label mask only.
        _emit(jnp.where(same, pos_vals, 0.0),
              jnp.where(same, 0.0, neg_vals))

    @pl.when(needs_mask)
    def _masked():
        row_ids = jax.lax.broadcasted_iota(jnp.int32, (tm, tn), 0) + row0
        col_ids = jax.lax.broadcasted_iota(jnp.int32, (tm, tn), 1) + col0
        keep = col_ids > row_ids        # strict upper triangle: dedups pairs, drops diag
        if n_pad != n_valid:
            keep = jnp.logical_and(
                keep, jnp.logical_and(row_ids < n_valid, col_ids < n_valid))
        pos_mask = jnp.logical_and(same, keep)
        neg_mask = jnp.logical_and(jnp.logical_not(same), keep)
        _emit(jnp.where(pos_mask, pos_vals, 0.0),
              jnp.where(neg_mask, neg_vals, 0.0))


def contrastive_loss_pallas(embeddings, labels, pos_margin=0.0, neg_margin=1.0,
                            tm=256, tn=512):
    n, d = embeddings.shape
    tm = int(tm)
    tn = int(tn)
    if n <= tm:
        # Single (square) block covering the whole batch.
        tm = tn = _round_up(max(n, 1), 8)
    assert tn % tm == 0, "tn must be a multiple of tm"
    n_pad = _round_up(n, tn)
    nbi = n_pad // tm
    nbj = n_pad // tn

    x = embeddings.astype(jnp.float32)
    lab = labels.astype(jnp.int32).reshape(n)
    if n_pad != n:
        x = jnp.pad(x, ((0, n_pad - n), (0, 0)))
        lab = jnp.pad(lab, (0, n_pad - n), constant_values=-1)
    lab_col = lab.reshape(n_pad, 1)
    lab_row = lab.reshape(1, n_pad)

    # Prologue: L2-normalize the embeddings exactly once.
    xn = pl.pallas_call(
        _normalize_kernel,
        out_shape=jax.ShapeDtypeStruct((n_pad, d), jnp.float32),
        grid=(nbi,),
        in_specs=[pl.BlockSpec((tm, d), lambda i: (i, 0))],
        out_specs=pl.BlockSpec((tm, d), lambda i: (i, 0)),
        compiler_params=pltpu.CompilerParams(dimension_semantics=("parallel",)),
    )(x)

    # Host-side triangular block schedule (i-major so the lhs row-block stays resident).
    # A block is visited iff it intersects the strict upper triangle and is not fully
    # inside the padded tail.
    bis, bjs = [], []
    for i in range(nbi):
        if i * tm >= n:
            continue
        for jb in range(nbj):
            if jb * tn >= n:
                continue
            if (jb + 1) * tn - 1 > i * tm:
                bis.append(i)
                bjs.append(jb)
    n_steps = len(bis)
    bi_arr = jnp.asarray(bis, dtype=jnp.int32)
    bj_arr = jnp.asarray(bjs, dtype=jnp.int32)

    kernel = functools.partial(
        _pair_block_kernel,
        pos_margin=float(pos_margin),
        neg_margin=float(neg_margin),
        n_valid=n,
        n_pad=n_pad,
    )

    partials = pl.pallas_call(
        kernel,
        out_shape=jax.ShapeDtypeStruct((n_steps, 1, 128), jnp.float32),
        grid_spec=pltpu.PrefetchScalarGridSpec(
            num_scalar_prefetch=2,
            grid=(n_steps,),
            in_specs=[
                pl.BlockSpec((tm, d), lambda t, bi, bj: (bi[t], 0)),   # lhs rows (resident)
                pl.BlockSpec((tn, d), lambda t, bi, bj: (bj[t], 0)),   # rhs rows
                pl.BlockSpec((tm, 1), lambda t, bi, bj: (bi[t], 0)),   # labels column slice
                pl.BlockSpec((1, tn), lambda t, bi, bj: (0, bj[t])),   # labels row slice
            ],
            out_specs=pl.BlockSpec((1, 1, 128), lambda t, bi, bj: (t, 0, 0)),
        ),
        compiler_params=pltpu.CompilerParams(
            # No cross-step state -> safe to shard steps across v7x's two TensorCores.
            dimension_semantics=("parallel",),
            vmem_limit_bytes=32 * 1024 * 1024,
        ),
    )(bi_arr, bj_arr, xn, xn, lab_col, lab_row)

    # Tiny epilogue: AvgNonZeroReducer per pair type, then sum (MultipleReducers).
    p = partials[:, 0, :]
    pos_sum = jnp.sum(p[:, 0])
    pos_cnt = jnp.sum(p[:, 1])
    neg_sum = jnp.sum(p[:, 2])
    neg_cnt = jnp.sum(p[:, 3])
    pos_loss = jnp.where(pos_cnt > 0.0, pos_sum / jnp.maximum(pos_cnt, 1.0), 0.0)
    neg_loss = jnp.where(neg_cnt > 0.0, neg_sum / jnp.maximum(neg_cnt, 1.0), 0.0)
    return pos_loss + neg_loss


def contrastive_loss_ref(embeddings, labels, pos_margin=0.0, neg_margin=1.0):
    """Pure-JAX reference mirroring pytorch-metric-learning ContrastiveLoss."""
    x = embeddings.astype(jnp.float32)
    xn = x / jnp.maximum(jnp.linalg.norm(x, axis=-1, keepdims=True), 1e-12)
    d2 = jnp.maximum(2.0 - 2.0 * (xn @ xn.T), 0.0)
    dist = jnp.sqrt(d2)
    n = x.shape[0]
    same = labels[:, None] == labels[None, :]
    not_diag = ~jnp.eye(n, dtype=bool)
    pos_mask = same & not_diag
    neg_mask = ~same
    pos_vals = jnp.maximum(dist - pos_margin, 0.0)
    neg_vals = jnp.maximum(neg_margin - dist, 0.0)

    def avg_nonzero(vals, mask):
        sel = jnp.where(mask, vals, 0.0)
        cnt = jnp.sum(jnp.where(mask & (vals > 0.0), 1.0, 0.0))
        return jnp.where(cnt > 0.0, jnp.sum(sel) / jnp.maximum(cnt, 1.0), 0.0)

    return avg_nonzero(pos_vals, pos_mask) + avg_nonzero(neg_vals, neg_mask)


if __name__ == "__main__":
    key = jax.random.PRNGKey(0)
    k1, k2, k3, k4, k5, k6 = jax.random.split(key, 6)

    POS_MARGIN, NEG_MARGIN = 0.0, 1.0      # PML defaults
    TOL = dict(atol=5e-3, rtol=5e-3)       # MXU f32 path vs XLA matmul precision path

    # 1) Tiny single-block path.
    N, D = 8, 32
    emb = jax.random.normal(k1, (N, D), dtype=jnp.float32)
    lbl = jax.random.randint(k2, (N,), 0, 3, dtype=jnp.int32)
    loss = jax.block_until_ready(contrastive_loss_pallas(emb, lbl, POS_MARGIN, NEG_MARGIN))
    ref = contrastive_loss_ref(emb, lbl, POS_MARGIN, NEG_MARGIN)
    assert jnp.allclose(loss, ref, **TOL), (loss, ref)

    # 2) Padded, diagonal-straddling general path (300 -> 512, two steps, masked path).
    N2, D2 = 300, 64
    emb2 = jax.random.normal(k3, (N2, D2), dtype=jnp.float32)
    lbl2 = jax.random.randint(k4, (N2,), 0, 7, dtype=jnp.int32)
    loss2 = jax.block_until_ready(contrastive_loss_pallas(emb2, lbl2, POS_MARGIN, NEG_MARGIN))
    ref2 = contrastive_loss_ref(emb2, lbl2, POS_MARGIN, NEG_MARGIN)
    assert jnp.allclose(loss2, ref2, **TOL), (loss2, ref2)

    # 3) Multi-block, no padding: exercises both the fast (unmasked) and masked paths
    #    plus a nonzero pos_margin / custom neg_margin.
    N3, D3 = 1024, 32
    emb3 = jax.random.normal(k5, (N3, D3), dtype=jnp.float32)
    lbl3 = jax.random.randint(k6, (N3,), 0, 13, dtype=jnp.int32)
    loss3 = jax.block_until_ready(contrastive_loss_pallas(emb3, lbl3, 0.1, 0.8))
    ref3 = contrastive_loss_ref(emb3, lbl3, 0.1, 0.8)
    assert jnp.allclose(loss3, ref3, **TOL), (loss3, ref3)

    print("KERNEL_OK")
</pallas_src>

<mosaic_0001>
module attributes {stable_mosaic.version = 11 : i64} {
  func.func @_normalize_kernel(%arg0: i32, %arg1: memref<8x32xf32, #tpu.memory_space<vmem>>, %arg2: memref<8x32xf32, #tpu.memory_space<vmem>>) attributes {dimension_semantics = [#tpu.dimension_semantics<parallel>], iteration_bounds = array<i64: 1>, scalar_prefetch = 0 : i64, scratch_operands = 0 : i64, tpu.core_type = #tpu.core_type<tc>, window_params = [{transform_indices = @transform_0, window_bounds = array<i64: 8, 32>}, {transform_indices = @transform_1, window_bounds = array<i64: 8, 32>}]} {
    %c0 = arith.constant 0 : index
    %c0_0 = arith.constant 0 : index
    %0 = vector.load %arg1[%c0, %c0_0] : memref<8x32xf32, #tpu.memory_space<vmem>>, vector<8x32xf32>
    %1 = arith.mulf %0, %0 : vector<8x32xf32>
    %cst = arith.constant dense<0.000000e+00> : vector<8xf32>
    %2 = vector.multi_reduction <add>, %1, %cst [1] : vector<8x32xf32> to vector<8xf32>
    %3 = vector.shape_cast %2 : vector<8xf32> to vector<8x1xf32>
    %cst_1 = arith.constant 1.000000e-24 : f32
    %4 = vector.broadcast %cst_1 : f32 to vector<8x1xf32>
    %5 = arith.maximumf %3, %4 : vector<8x1xf32>
    %6 = math.rsqrt %5 : vector<8x1xf32>
    %7 = vector.broadcast %6 : vector<8x1xf32> to vector<8x32xf32>
    %8 = arith.mulf %0, %7 : vector<8x32xf32>
    %c0_2 = arith.constant 0 : index
    %c0_3 = arith.constant 0 : index
    %9 = vector.load %arg2[%c0_2, %c0_3] : memref<8x32xf32, #tpu.memory_space<vmem>>, vector<8x32xf32>
    tpu.vector_store %arg2[%c0_2, %c0_3], %8 {strides = array<i32>} : memref<8x32xf32, #tpu.memory_space<vmem>>, vector<8x32xf32>,
    return
  }
  func.func @transform_0(%arg0: i32) -> (i32, i32) {
    %c0_i32 = arith.constant 0 : i32
    %c0_i32_0 = arith.constant 0 : i32
    return %arg0, %c0_i32 : i32, i32
  }
  func.func @transform_1(%arg0: i32) -> (i32, i32) {
    %c0_i32 = arith.constant 0 : i32
    %c0_i32_0 = arith.constant 0 : i32
    return %arg0, %c0_i32 : i32, i32
  }
}

</mosaic_0001>

<bundles_post_ra>
// kernel: tpu_custom_call.1
= control target key start
LH: loop header
LB: loop body
LE: loop exit
PB: predicated region body
PF: predicated region fallthrough
CT: control target
= control target key end

     0   :  { %6 = vsyncpa [#allocation3], 0  ;;  %s134_s0 = inlined_call_operand.hbm [shape: f32[8,32], index: 0, kind: input, shape index: {}]   ;;  %s135_s1 = inlined_call_operand.hbm [shape: f32[8,32], index: 1, kind: output, shape index: {}]  }
   0x1   :  { %7 = vsyncpa [#allocation4], 0  ;;  %s98_s6 = smov [#allocation2]   ;;  %s50_s10 = scalar_lea.hbm %s134_s0, 128 }
   0x2   :  { %s14_s7 = sshll.u32 %s98_s6, 4  ;;  %p51_p0 = scmp.ne.s32.totalorder %s134_s0, %s50_s10  ;;  %s15_s7 = int_to_ptr.vmem [resolvable:$true] %s14_s7 }
   0x3   :  { %p54_p1 = scmp.lt.u32.totalorder %s50_s10, %s134_s0 }
   0x5   :  { %p56_p2 = pnand %p54_p1, %p51_p0 }
   0x7   :  { %59 = shalt.err (!%p56_p2)
}
   0x8   :  { %s60_s15 = scalar_lea.vmem %s15_s7, 128  ;;  %p65_p4 = scmp.lt.s32.totalorder %s15_s7, %s15_s7 }
   0x9   :  { %p61_p3 = scmp.ne.s32.totalorder %s15_s7, %s60_s15  ;;  %p66_p5 = scmp.lt.s32.totalorder %s60_s15, %s60_s15 }
   0xb   :  { %p67_p6 = por %p66_p5, %p65_p4 }
   0xd   :  { %p68_p7 = pnand %p67_p6, %p61_p3 }
   0xf   :  { %71 = shalt.err (!%p68_p7)
}
  0x10   :  { %17 = dma.hbm_to_vmem [thread:$0]  %s134_s0, 128, %s15_s7, [#allocation3]  }
  0x11   :  { %94 = dma.done.wait [#allocation3], 128  }
  0x12   :  { %95 = vsyncadd [#allocation3], 4294967168  ;;  %v21_v0 = vld [vmem:[#allocation2] sm:$0xff]  ;;  %vm23_vm0 = vcmask 261120   ;;  %s99_s18 = smov [#allocation5]  }
  0x13   :  { %v22_v1 = vmul.f32 %v21_v0, %v21_v0  ;;  %s37_s19 = sshll.u32 %s99_s18, 4  ;;  %s38_s19 = int_to_ptr.vmem [resolvable:$true] %s37_s19 }
  0x14   :  { %s72_s20 = scalar_lea.vmem %s38_s19, 128  ;;  %p77_p9 = scmp.lt.s32.totalorder %s38_s19, %s38_s19 }
  0x15   :  { %v24_v2 = vsel %vm23_vm0, %v22_v1, 0.0  ;;  %p73_p8 = scmp.ne.s32.totalorder %s38_s19, %s72_s20  ;;  %p78_p10 = scmp.lt.s32.totalorder %s72_s20, %s72_s20 }
  0x16   :  { %25 = vadd.xlane.f32.xlu0 %v24_v2 }
  0x17   :  { %p79_p11 = por %p78_p10, %p77_p9 }
  0x19   :  { %p80_p12 = pnand %p79_p11, %p73_p8 }
  0xa3   :  { %v26_v3 = vpop.xlane.xlu0 %25 }
  0xa4   :  { %v27_v4 = vmax.f32 %v26_v3, 1e-24 }
  0xa6   :  { %48 = vrsqrt.f32 %v27_v4 }
  0xb0   :  { %v49_v5 = vpop.eup %48 }
  0xb1   :  { %v29_v6 = vmul.f32 %v49_v5, %v21_v0 }
  0xb3   :  { %30 = vst.msk [vmem:[#allocation5] sm:$0xff] %vm23_vm0, %v29_v6 }
  0xb4   :  { %83 = shalt.err (!%p80_p12)
}
  0xb5   :  { %s84_s22 = scalar_lea.hbm %s135_s1, 128 }
  0xb6   :  { %p85_p13 = scmp.ne.s32.totalorder %s135_s1, %s84_s22  ;;  %p88_p0 = scmp.lt.u32.totalorder %s84_s22, %s135_s1 }
  0xb8   :  { %p90_p1 = pnand %p88_p0, %p85_p13 }
  0xba   :  { %93 = shalt.err (!%p90_p1)
}
  0xbb   :  { %40 = dma.vmem_to_hbm [thread:$0]  %s38_s19, 128, %s135_s1, [#allocation4]  }
  0xbc   :  { %96 = dma.done.wait [#allocation4], 128  }
  0xbd   :  { %97 = vsyncadd [#allocation4], 4294967168 }
  0xbe   :  { %44 = vsyncpa [#allocation3], 1 }
  0xbf   :  { %45 = vsyncpa [#allocation4], 1 }

</bundles_post_ra>
